<compile_context>
chip_gen: v7x
topology: tpu7x:2x2x1
jax: 0.10.0
libtpu: 0.0.40
codegen_flags: <defaults>
</compile_context>

<pallas_src>
import jax
import jax.numpy as jnp
from jax.experimental import pallas as pl
from jax.experimental.pallas import tpu as pltpu


def _key_event_attention_kernel(key_ref, value_ref, wk_ref, wv_ref, wa_ref,
                                ctx_ref, attn_ref):
    # key_ref:  (BB, Dk)  f32     value_ref: (BB, T, Dv) f32
    # wk_ref:   (Dk, CAD) bf16    wv_ref:    (Dv, CAD)   bf16
    # wa_ref:   (1, CAD)  f32
    # ctx_ref:  (BB, Dv)  f32     attn_ref:  (BB, T)     f32  (lane-dense)
    BB, T, Dv = value_ref.shape
    CAD = wk_ref.shape[1]

    k = key_ref[...]                                   # (BB, Dk) f32
    v = value_ref[...]                                 # (BB, T, Dv) f32
    v2d = v.reshape(BB * T, Dv)                        # (BB*T, Dv)

    # Projections on the MXU: bf16 operands, f32 accumulation.
    kproj = jnp.dot(k.astype(jnp.bfloat16), wk_ref[...],
                    preferred_element_type=jnp.float32)          # (BB, CAD)
    vproj = jnp.dot(v2d.astype(jnp.bfloat16), wv_ref[...],
                    preferred_element_type=jnp.float32)          # (BB*T, CAD)
    vproj = vproj.reshape(BB, T, CAD)

    inter = jnp.tanh(kproj[:, None, :] + vproj)                  # (BB, T, CAD) f32

    # attention_cad (CAD -> 1 Linear) as a lane-wise multiply + lane reduce
    # (VPU + XLU) instead of an N=1 MXU matmul.
    wa_row = wa_ref[...]                                         # (1, CAD) f32
    scores = jnp.sum(inter * wa_row[None, :, :], axis=-1)        # (BB, T)

    # Softmax over T (lane axis), f32, with EUP reciprocal for the denominator.
    m = jnp.max(scores, axis=-1, keepdims=True)                  # (BB, 1)
    e = jnp.exp(scores - m)                                      # (BB, T)
    denom = jnp.sum(e, axis=-1, keepdims=True)                   # (BB, 1)
    w = e * pl.reciprocal(denom, approx=True)                    # (BB, T)

    # context_b = sum_t w[b,t] * v[b,t,:]  as a batched (1,T) x (T,Dv) contraction.
    ctx = jnp.einsum('bqt,btd->bqd', w[:, None, :], v,
                     preferred_element_type=jnp.float32)         # (BB, 1, Dv)

    ctx_ref[...] = ctx[:, 0, :].astype(ctx_ref.dtype)
    attn_ref[...] = w.astype(attn_ref.dtype)


def _pick_bb(B, T, Dv, CAD):
    """Batch rows per grid step: target ~256 MXU rows (BB*T), VMEM-capped for v7x."""
    target = max(1, 256 // max(T, 1))
    # Keep the f32 (BB, T, CAD) intermediates (a few live copies) well under the
    # v7x 64 MiB VMEM / 32 MiB scoped budget, leaving room for double-buffered tiles.
    cap = max(1, (8 * 1024 * 1024) // (max(T * CAD, T * Dv) * 4 * 4))
    want = max(1, min(target, cap, B))
    bb = 1
    for d in range(1, want + 1):            # largest divisor of B <= want -> exact tiling
        if B % d == 0:
            bb = d
    return bb


def key_event_attention(key, value, wk, wv, wa, block_b=None):
    """key: [B, Dk], value: [B, T, Dv].
    wk: [CAD, Dk], wv: [CAD, Dv], wa: [1, CAD]  (PyTorch Linear weight layout).
    Returns (context [B, Dv], attention_weights [B, T])."""
    B, Dk = key.shape
    _, T, Dv = value.shape
    CAD = wk.shape[0]

    BB = block_b if block_b is not None else _pick_bb(B, T, Dv, CAD)
    assert B % BB == 0, "block_b must divide the batch size"

    # Pre-transpose weights to [in, out] so the kernel does x @ W directly,
    # and cast the projection weights to bf16 for the MXU.
    wk_t = wk.T.astype(jnp.bfloat16)        # (Dk, CAD)
    wv_t = wv.T.astype(jnp.bfloat16)        # (Dv, CAD)
    wa_row = wa.astype(jnp.float32)         # (1, CAD) — stays f32 for the VPU reduce

    key = key.astype(jnp.float32)
    value = value.astype(jnp.float32)

    ctx, attn = pl.pallas_call(
        _key_event_attention_kernel,
        out_shape=(
            jax.ShapeDtypeStruct((B, Dv), jnp.float32),
            jax.ShapeDtypeStruct((B, T), jnp.float32),
        ),
        grid_spec=pltpu.PrefetchScalarGridSpec(
            num_scalar_prefetch=0,
            grid=(B // BB,),
            in_specs=[
                pl.BlockSpec((BB, Dk), lambda b: (b, 0)),
                pl.BlockSpec((BB, T, Dv), lambda b: (b, 0, 0)),
                pl.BlockSpec((Dk, CAD), lambda b: (0, 0)),
                pl.BlockSpec((Dv, CAD), lambda b: (0, 0)),
                pl.BlockSpec((1, CAD), lambda b: (0, 0)),
            ],
            out_specs=[
                pl.BlockSpec((BB, Dv), lambda b: (b, 0)),
                pl.BlockSpec((BB, T), lambda b: (b, 0)),
            ],
        ),
        compiler_params=pltpu.CompilerParams(
            dimension_semantics=("parallel",),
            vmem_limit_bytes=32 * 1024 * 1024,
        ),
    )(key, value, wk_t, wv_t, wa_row)

    return ctx, attn


def _reference(key, value, wk, wv, wa, matmul_dtype=jnp.float32):
    """Pure-JAX reference. With matmul_dtype=bf16 it matches the kernel's
    projection precision (bf16 operands, f32 accumulation)."""
    key_cad = jnp.dot(key.astype(matmul_dtype), wk.T.astype(matmul_dtype),
                      preferred_element_type=jnp.float32)             # (B, CAD)
    value_cad = jnp.dot(value.astype(matmul_dtype), wv.T.astype(matmul_dtype),
                        preferred_element_type=jnp.float32)           # (B, T, CAD)
    inter = jnp.tanh(key_cad[:, None, :] + value_cad)                 # (B, T, CAD)
    scores = jnp.einsum('btc,c->bt', inter, wa[0].astype(jnp.float32))
    weights = jax.nn.softmax(scores, axis=1)                          # (B, T)
    context = jnp.einsum('bt,btd->bd', weights, value.astype(jnp.float32))
    return context, weights


if __name__ == "__main__":
    B, T = 2, 8
    KEY_DIM, VALUE_DIM, CAD = 32, 32, 128

    root = jax.random.PRNGKey(0)
    k1, k2, k3, k4, k5 = jax.random.split(root, 5)

    # deterministic "parameters" (PyTorch Linear weight layout: [out, in])
    wk = jax.random.normal(k1, (CAD, KEY_DIM), jnp.float32) / jnp.sqrt(KEY_DIM)
    wv = jax.random.normal(k2, (CAD, VALUE_DIM), jnp.float32) / jnp.sqrt(VALUE_DIM)
    wa = jax.random.normal(k3, (1, CAD), jnp.float32) / jnp.sqrt(CAD)

    key_tensor = jax.random.normal(k4, (B, KEY_DIM), jnp.float32)
    value_tensor = jax.random.normal(k5, (B, T, VALUE_DIM), jnp.float32)

    ctx, attn = key_event_attention(key_tensor, value_tensor, wk, wv, wa)
    jax.block_until_ready((ctx, attn))

    # Compare against a precision-matched reference (bf16 projection operands,
    # f32 accumulation — same as the kernel). Tolerance covers the EUP
    # approx-reciprocal in the softmax normalization (~2^-12 relative).
    ctx_ref, attn_ref = _reference(key_tensor, value_tensor, wk, wv, wa,
                                   matmul_dtype=jnp.bfloat16)
    assert ctx.shape == (B, VALUE_DIM) and attn.shape == (B, T)
    assert jnp.allclose(ctx, ctx_ref, atol=2e-3, rtol=2e-3)
    assert jnp.allclose(attn, attn_ref, atol=2e-3, rtol=2e-3)

    print("KERNEL_OK")
</pallas_src>

<mosaic_0001>
module attributes {stable_mosaic.version = 11 : i64} {
  func.func @_key_event_attention_kernel(%arg0: i32, %arg1: memref<2x32xf32, #tpu.memory_space<vmem>>, %arg2: memref<2x8x32xf32, #tpu.memory_space<vmem>>, %arg3: memref<32x128xbf16, #tpu.memory_space<vmem>>, %arg4: memref<32x128xbf16, #tpu.memory_space<vmem>>, %arg5: memref<1x128xf32, #tpu.memory_space<vmem>>, %arg6: memref<2x32xf32, #tpu.memory_space<vmem>>, %arg7: memref<2x8xf32, #tpu.memory_space<vmem>>) attributes {dimension_semantics = [#tpu.dimension_semantics<parallel>], iteration_bounds = array<i64: 1>, scalar_prefetch = 0 : i64, scratch_operands = 0 : i64, tpu.core_type = #tpu.core_type<tc>, window_params = [{transform_indices = @transform_0, window_bounds = array<i64: 2, 32>}, {transform_indices = @transform_1, window_bounds = array<i64: 2, 8, 32>}, {pipeline_mode = #tpu.pipeline_mode<synchronous>, transform_indices = @transform_2, window_bounds = array<i64: 32, 128>}, {pipeline_mode = #tpu.pipeline_mode<synchronous>, transform_indices = @transform_3, window_bounds = array<i64: 32, 128>}, {pipeline_mode = #tpu.pipeline_mode<synchronous>, transform_indices = @transform_4, window_bounds = array<i64: 1, 128>}, {transform_indices = @transform_5, window_bounds = array<i64: 2, 32>}, {transform_indices = @transform_6, window_bounds = array<i64: 2, 8>}]} {
    %c0 = arith.constant 0 : index
    %c0_0 = arith.constant 0 : index
    %0 = vector.load %arg1[%c0, %c0_0] : memref<2x32xf32, #tpu.memory_space<vmem>>, vector<2x32xf32>
    %c0_1 = arith.constant 0 : index
    %c0_2 = arith.constant 0 : index
    %c0_3 = arith.constant 0 : index
    %1 = vector.load %arg2[%c0_1, %c0_2, %c0_3] : memref<2x8x32xf32, #tpu.memory_space<vmem>>, vector<2x8x32xf32>
    %2 = vector.shape_cast %1 : vector<2x8x32xf32> to vector<16x32xf32>
    %3 = arith.truncf %0 : vector<2x32xf32> to vector<2x32xbf16>
    %c0_4 = arith.constant 0 : index
    %c0_5 = arith.constant 0 : index
    %4 = vector.load %arg3[%c0_4, %c0_5] : memref<32x128xbf16, #tpu.memory_space<vmem>>, vector<32x128xbf16>
    %cst = arith.constant dense<0.000000e+00> : vector<2x128xf32>
    %5 = tpu.matmul %3, %4, %cst {dimension_numbers = #tpu.dot_dimension_numbers<[1], [0], [0], [1], [0, 0, 1, 1], [], []>} : vector<2x32xbf16>, vector<32x128xbf16>, vector<2x128xf32> -> vector<2x128xf32>
    %6 = arith.truncf %2 : vector<16x32xf32> to vector<16x32xbf16>
    %c0_6 = arith.constant 0 : index
    %c0_7 = arith.constant 0 : index
    %7 = vector.load %arg4[%c0_6, %c0_7] : memref<32x128xbf16, #tpu.memory_space<vmem>>, vector<32x128xbf16>
    %cst_8 = arith.constant dense<0.000000e+00> : vector<16x128xf32>
    %8 = tpu.matmul %6, %7, %cst_8 {dimension_numbers = #tpu.dot_dimension_numbers<[1], [0], [0], [1], [0, 0, 1, 1], [], []>} : vector<16x32xbf16>, vector<32x128xbf16>, vector<16x128xf32> -> vector<16x128xf32>
    %9 = vector.shape_cast %8 : vector<16x128xf32> to vector<2x8x128xf32>
    %10 = vector.shape_cast %5 : vector<2x128xf32> to vector<2x1x128xf32>
    %11 = vector.broadcast %10 : vector<2x1x128xf32> to vector<2x8x128xf32>
    %12 = arith.addf %11, %9 : vector<2x8x128xf32>
    %13 = math.tanh %12 : vector<2x8x128xf32>
    %c0_9 = arith.constant 0 : index
    %c0_10 = arith.constant 0 : index
    %14 = vector.load %arg5[%c0_9, %c0_10] : memref<1x128xf32, #tpu.memory_space<vmem>>, vector<1x128xf32>
    %15 = vector.shape_cast %14 : vector<1x128xf32> to vector<1x1x128xf32>
    %16 = vector.broadcast %15 : vector<1x1x128xf32> to vector<2x8x128xf32>
    %17 = arith.mulf %13, %16 : vector<2x8x128xf32>
    %cst_11 = arith.constant dense<0.000000e+00> : vector<2x8xf32>
    %18 = vector.multi_reduction <add>, %17, %cst_11 [2] : vector<2x8x128xf32> to vector<2x8xf32>
    %cst_12 = arith.constant dense<0xFF800000> : vector<2xf32>
    %19 = vector.multi_reduction <maximumf>, %18, %cst_12 [1] : vector<2x8xf32> to vector<2xf32>
    %20 = vector.shape_cast %19 : vector<2xf32> to vector<2x1xf32>
    %21 = vector.broadcast %20 : vector<2x1xf32> to vector<2x8xf32>
    %22 = arith.subf %18, %21 : vector<2x8xf32>
    %23 = math.exp %22 : vector<2x8xf32>
    %cst_13 = arith.constant dense<0.000000e+00> : vector<2xf32>
    %24 = vector.multi_reduction <add>, %23, %cst_13 [1] : vector<2x8xf32> to vector<2xf32>
    %25 = vector.shape_cast %24 : vector<2xf32> to vector<2x1xf32>
    %26 = tpu.reciprocal %25 {approx = true} : vector<2x1xf32> -> vector<2x1xf32>
    %27 = vector.broadcast %26 : vector<2x1xf32> to vector<2x8xf32>
    %28 = arith.mulf %23, %27 : vector<2x8xf32>
    %29 = vector.shape_cast %28 : vector<2x8xf32> to vector<2x1x8xf32>
    "tpu.trace_start"() <{level = 10 : i32, message = "bqt,btd->bqd"}> : () -> ()
    %cst_14 = arith.constant dense<0.000000e+00> : vector<2x1x32xf32>
    %30 = tpu.matmul %29, %1, %cst_14 {dimension_numbers = #tpu.dot_dimension_numbers<[2], [1], [1], [2], [0, 0, 0, 1, 1, 2], [0], [0]>} : vector<2x1x8xf32>, vector<2x8x32xf32>, vector<2x1x32xf32> -> vector<2x1x32xf32>
    "tpu.trace_stop"() : () -> ()
    %31 = vector.shape_cast %30 : vector<2x1x32xf32> to vector<2x32xf32>
    %c0_15 = arith.constant 0 : index
    %c0_16 = arith.constant 0 : index
    %32 = vector.load %arg6[%c0_15, %c0_16] : memref<2x32xf32, #tpu.memory_space<vmem>>, vector<2x32xf32>
    tpu.vector_store %arg6[%c0_15, %c0_16], %31 {strides = array<i32>} : memref<2x32xf32, #tpu.memory_space<vmem>>, vector<2x32xf32>,
    %c0_17 = arith.constant 0 : index
    %c0_18 = arith.constant 0 : index
    %33 = vector.load %arg7[%c0_17, %c0_18] : memref<2x8xf32, #tpu.memory_space<vmem>>, vector<2x8xf32>
    tpu.vector_store %arg7[%c0_17, %c0_18], %28 {strides = array<i32>} : memref<2x8xf32, #tpu.memory_space<vmem>>, vector<2x8xf32>,
    return
  }
  func.func @transform_0(%arg0: i32) -> (i32, i32) {
    %c0_i32 = arith.constant 0 : i32
    %c0_i32_0 = arith.constant 0 : i32
    return %arg0, %c0_i32 : i32, i32
  }
  func.func @transform_1(%arg0: i32) -> (i32, i32, i32) {
    %c0_i32 = arith.constant 0 : i32
    %c0_i32_0 = arith.constant 0 : i32
    %c0_i32_1 = arith.constant 0 : i32
    return %arg0, %c0_i32, %c0_i32_0 : i32, i32, i32
  }
  func.func @transform_2(%arg0: i32) -> (i32, i32) {
    %c0_i32 = arith.constant 0 : i32
    %c0_i32_0 = arith.constant 0 : i32
    %c0_i32_1 = arith.constant 0 : i32
    return %c0_i32, %c0_i32_0 : i32, i32
  }
  func.func @transform_3(%arg0: i32) -> (i32, i32) {
    %c0_i32 = arith.constant 0 : i32
    %c0_i32_0 = arith.constant 0 : i32
    %c0_i32_1 = arith.constant 0 : i32
    return %c0_i32, %c0_i32_0 : i32, i32
  }
  func.func @transform_4(%arg0: i32) -> (i32, i32) {
    %c0_i32 = arith.constant 0 : i32
    %c0_i32_0 = arith.constant 0 : i32
    %c0_i32_1 = arith.constant 0 : i32
    return %c0_i32, %c0_i32_0 : i32, i32
  }
  func.func @transform_5(%arg0: i32) -> (i32, i32) {
    %c0_i32 = arith.constant 0 : i32
    %c0_i32_0 = arith.constant 0 : i32
    return %arg0, %c0_i32 : i32, i32
  }
  func.func @transform_6(%arg0: i32) -> (i32, i32) {
    %c0_i32 = arith.constant 0 : i32
    %c0_i32_0 = arith.constant 0 : i32
    return %arg0, %c0_i32 : i32, i32
  }
}

</mosaic_0001>

<bundles_post_ra>
// kernel: tpu_custom_call.1
= control target key start
LH: loop header
LB: loop body
LE: loop exit
PB: predicated region body
PF: predicated region fallthrough
CT: control target
= control target key end

     0   :  { %12 = vsyncpa [#allocation3], 0  ;;  %s890_s0 = inlined_call_operand.hbm [shape: f32[2,32], index: 0, kind: input, shape index: {}]   ;;  %s891_s1 = inlined_call_operand.hbm [shape: f32[2,8,32], index: 1, kind: input, shape index: {}]   ;;  %s892_s2 = inlined_call_operand.hbm [shape: bf16[32,128], index: 2, kind: input, shape index: {}]   ;;  %s893_s3 = inlined_call_operand.hbm [shape: bf16[32,128], index: 3, kind: input, shape index: {}]   ;;  %s894_s4 = inlined_call_operand.vmem [shape: f32[1,128], index: 4, kind: input, shape index: {}]   ;;  %s895_s5 = inlined_call_operand.hbm [shape: f32[2,32], index: 5, kind: output, shape index: {0}]   ;;  %s896_s6 = inlined_call_operand.hbm [shape: f32[2,8], index: 6, kind: output, shape index: {1}]  }
   0x1   :  { %13 = vsyncpa [#allocation6], 0 }
   0x2   :  { %14 = vsyncpa [#allocation9], 0 }
   0x3   :  { %15 = vsyncpa [#allocation4], 0 }
   0x4   :  { %16 = vsyncpa [#allocation12], 0  ;;  %s743_s21 = smov [#allocation5]   ;;  %s601_s25 = scalar_lea.hbm %s891_s1, 256 }
   0x5   :  { %s32_s22 = sshll.u32 %s743_s21, 4  ;;  %p602_p0 = scmp.ne.s32.totalorder %s891_s1, %s601_s25  ;;  %s33_s22 = int_to_ptr.vmem [resolvable:$true] %s32_s22 }
   0x6   :  { %p605_p1 = scmp.lt.u32.totalorder %s601_s25, %s891_s1 }
   0x8   :  { %p607_p2 = pnand %p605_p1, %p602_p0 }
   0xa   :  { %610 = shalt.err (!%p607_p2)
}
   0xb   :  { %s611_s30 = scalar_lea.vmem %s33_s22, 256  ;;  %p616_p4 = scmp.lt.s32.totalorder %s33_s22, %s33_s22 }
   0xc   :  { %p612_p3 = scmp.ne.s32.totalorder %s33_s22, %s611_s30  ;;  %p617_p5 = scmp.lt.s32.totalorder %s611_s30, %s611_s30 }
   0xe   :  { %p618_p6 = por %p617_p5, %p616_p4 }
  0x10   :  { %p619_p7 = pnand %p618_p6, %p612_p3 }
  0x12   :  { %622 = shalt.err (!%p619_p7)
}
  0x13   :  { %s744_s7 = smov 128   ;;  %s745_s8 = smov 8  }
  0x14   :  { %38 = dma.hbm_to_vmem [thread:$0]  %s891_s1, 256, %s33_s22, [#allocation6], %s744_s7, %s744_s7, %s745_s8  }
  0x15   :  { %s746_s11 = smov [#allocation2]   ;;  %s747_s13 = smov [#allocation7]  }
  0x16   :  { %s23_s12 = sshll.u32 %s746_s11, 4  ;;  %s44_s14 = sshll.u32 %s747_s13, 4  ;;  %s24_s12 = int_to_ptr.vmem [resolvable:$true] %s23_s12  ;;  %s45_s14 = int_to_ptr.vmem [resolvable:$true] %s44_s14 }
  0x17   :  { %s623_s17 = scalar_lea.hbm %s890_s0, 32 }
  0x18   :  { %p624_p8 = scmp.ne.s32.totalorder %s890_s0, %s623_s17  ;;  %p627_p9 = scmp.lt.u32.totalorder %s623_s17, %s890_s0 }
  0x1a   :  { %p629_p10 = pnand %p627_p9, %p624_p8 }
  0x1c   :  { %632 = shalt.err (!%p629_p10)
}
  0x1d   :  { %s633_s1 = scalar_lea.vmem %s24_s12, 32  ;;  %p638_p12 = scmp.lt.s32.totalorder %s24_s12, %s24_s12 }
  0x1e   :  { %p634_p11 = scmp.ne.s32.totalorder %s24_s12, %s633_s1  ;;  %p639_p13 = scmp.lt.s32.totalorder %s633_s1, %s633_s1 }
  0x20   :  { %p640_p0 = por %p639_p13, %p638_p12 }
  0x22   :  { %p641_p1 = pnand %p640_p0, %p634_p11 }
  0x24   :  { %644 = shalt.err (!%p641_p1)
}
  0x25   :  { %26 = dma.hbm_to_vmem [thread:$0]  %s890_s0, 32, %s24_s12, [#allocation3]  }
  0x26   :  { %s645_s26 = scalar_lea.hbm %s892_s2, 256 }
  0x27   :  { %p646_p2 = scmp.ne.s32.totalorder %s892_s2, %s645_s26  ;;  %p649_p3 = scmp.lt.u32.totalorder %s645_s26, %s892_s2 }
  0x29   :  { %p651_p4 = pnand %p649_p3, %p646_p2 }
  0x2b   :  { %654 = shalt.err (!%p651_p4)
}
  0x2c   :  { %s655_s7 = scalar_lea.vmem %s45_s14, 256  ;;  %p660_p6 = scmp.lt.s32.totalorder %s45_s14, %s45_s14 }
  0x2d   :  { %p656_p5 = scmp.ne.s32.totalorder %s45_s14, %s655_s7  ;;  %p661_p7 = scmp.lt.s32.totalorder %s655_s7, %s655_s7 }
  0x2f   :  { %p662_p8 = por %p661_p7, %p660_p6 }
  0x31   :  { %p663_p9 = pnand %p662_p8, %p656_p5 }
  0x33   :  { %666 = shalt.err (!%p663_p9)
}
  0x34   :  { %s748_s0 = smov 64   ;;  %s749_s8 = smov 4  }
  0x35   :  { %50 = dma.hbm_to_vmem [thread:$0]  %s892_s2, 256, %s45_s14, [#allocation6], %s748_s0, %s748_s0, %s749_s8  }
  0x36   :  { %s750_s11 = smov [#allocation8]   ;;  %s667_s16 = scalar_lea.hbm %s893_s3, 256 }
  0x37   :  { %s56_s12 = sshll.u32 %s750_s11, 4  ;;  %p668_p10 = scmp.ne.s32.totalorder %s893_s3, %s667_s16  ;;  %s57_s12 = int_to_ptr.vmem [resolvable:$true] %s56_s12 }
  0x38   :  { %p671_p11 = scmp.lt.u32.totalorder %s667_s16, %s893_s3 }
  0x3a   :  { %p673_p12 = pnand %p671_p11, %p668_p10 }
  0x3c   :  { %676 = shalt.err (!%p673_p12)
}
  0x3d   :  { %s677_s21 = scalar_lea.vmem %s57_s12, 256  ;;  %p682_p0 = scmp.lt.s32.totalorder %s57_s12, %s57_s12 }
  0x3e   :  { %p678_p13 = scmp.ne.s32.totalorder %s57_s12, %s677_s21  ;;  %p683_p1 = scmp.lt.s32.totalorder %s677_s21, %s677_s21 }
  0x40   :  { %p684_p2 = por %p683_p1, %p682_p0 }
  0x42   :  { %p685_p3 = pnand %p684_p2, %p678_p13 }
  0x44   :  { %688 = shalt.err (!%p685_p3)
}
  0x45   :  { %62 = dma.hbm_to_vmem [thread:$0]  %s893_s3, 256, %s57_s12, [#allocation9], %s748_s0, %s748_s0, %s749_s8  }
  0x46   :  { %733 = dma.done.wait [#allocation3], 32  }
  0x47   :  { %734 = vsyncadd [#allocation3], 4294967264 }
  0x48   :  { %735 = dma.done.wait [#allocation6], 512  }
  0x49   :  { %736 = vsyncadd [#allocation6], 4294966784 }
  0x4a   :  { %737 = dma.done.wait [#allocation9], 256  }
  0x4b   :  { %738 = vsyncadd [#allocation9], 4294967040  ;;  %v751_v0 = vmov 0.0   ;;  %vm752_vm0 = vmmov 0   ;;  %v587_v1 = vld [vmem:[#allocation7] sm:$0xff]   ;;  %v588_v2 = vld [vmem:[#allocation8] sm:$0xff]   ;;  %v207_v12 = vlaneseq }
  0x4c   :  { %545 = vmatprep.subr.bf16.mxu0 %v751_v0  ;;  %553 = vmatprep.subr.bf16.mxu1 %v751_v0  ;;  %v589_v3 = vld [vmem:[#allocation7 + $0x8] sm:$0xff]   ;;  %v590_v5 = vld [vmem:[#allocation8 + $0x8] sm:$0xff]   ;;  %v79_v6 = vld [vmem:[#allocation5] sm:$0xff]  ;;  %vm98_vm1 = vcmask 261120   ;;  %v753_v10 = vmov 1966171168  }
  0x4d   :  { %549 = vmatprep.mubr.msk.bf16.mxu0 %vm752_vm0, %v751_v0  ;;  %557 = vmatprep.mubr.msk.bf16.mxu1 %vm752_vm0, %v751_v0  ;;  %v78_v4 = vld [vmem:[#allocation2] sm:$0x3]  ;;  %v80_v7 = vld [vmem:[#allocation5 + $0x8] sm:$0xff]  ;;  %v205_v11 = vunpack.c.l.s4 %v753_v10  ;;  %v844_v14 = vshrl.u32 %v207_v12, 7  ;;  %v256_v38 = vand.u32 127, %v207_v12  ;;  %vm265_vm2 = vcmask 1041409  }
  0x4e   :  { %546 = vmatpush3.bf16.msra.mxu0 %v587_v1  ;;  %554 = vmatpush3.bf16.msra.mxu1 %v588_v2  ;;  %v81_v8 = vpack.c.bf16 %v78_v4, %v78_v4  ;;  %v142_v9 = vpack.c.bf16 %v80_v7, %v79_v6  ;;  %v532_v33 = vld [vmem:[%s894_s4] ss:$0 sm:$0xff]  ;;  %vm268_vm3 = vcmask 58368   ;;  %v754_v46 = vmov 0   ;;  %s755_s4 = smov [#allocation11]  }
  0x4f   :  { %547 = vmatprep.subr.bf16.mxu0 %v751_v0  ;;  %555 = vmatprep.subr.bf16.mxu1 %v751_v0  ;;  %v206_v13 = vunpack.c.0.s8 %v205_v11  ;;  %v848_v20 = vsub.s32 0, %v844_v14  ;;  %v259_v40 = vsub.s32 %v256_v38, %v844_v14  ;;  %v279_v47 = vsub.s32 1, %v844_v14  ;;  %s511_s22 = sshll.u32 %s755_s4, 4  ;;  %s512_s22 = int_to_ptr.vmem [resolvable:$true] %s511_s22 }
  0x50   :  { %586 = vset.pattern.permute.xlu0 %v754_v46  ;;  %585 = vset.pattern.permute.xlu1 %v754_v46  ;;  %vm332_vm4 = vcmask 64512   ;;  %s689_s23 = scalar_lea.vmem %s512_s22, 32  ;;  %p694_p5 = scmp.lt.s32.totalorder %s512_s22, %s512_s22 }
  0x51   :  { %v209_v15 = vsub.s32 %v206_v13, %v844_v14  ;;  %p690_p4 = scmp.ne.s32.totalorder %s512_s22, %s689_s23  ;;  %p695_p6 = scmp.lt.s32.totalorder %s689_s23, %s689_s23 }
  0x52   :  { %548 = vmatpush3.bf16.msra.mxu0 %v589_v3  ;;  %556 = vmatpush3.bf16.msra.mxu1 %v590_v5 }
  0x53   :  { %561 = vmatprep.subr.mxu0 %v751_v0  ;;  %566 = vmatprep.subr.mxu1 %v751_v0  ;;  %p696_p7 = por %p695_p6, %p694_p5 }
  0x55   :  { %550 = vmatmul.mubr.msk.bf16.vlgmr.msra.gmra.mrb[0].mxu0 %vm98_vm1, %v81_v8  ;;  %558 = vmatmul.mubr.msk.bf16.vlgmr.msra.gmra.mrb[0].mxu1 %vm98_vm1, %v142_v9  ;;  %p697_p8 = pnand %p696_p7, %p690_p4 }
  0x56   :  { %562 = vmatpush3.msra.mxu0 %v79_v6  ;;  %567 = vmatpush3.msra.mxu1 %v80_v7 }
  0x57   :  { %568 = vmatprep.mubr.msk.f32.mxu1 %vm752_vm0, %v751_v0  ;;  %563 = vmatprep.mubr.msk.f32.mxu0 %vm752_vm0, %v751_v0 }
 0x128   :  { %v136_v16 = vpop.f32.mrb[0].mxu0  ;;  %v196_v19 = vpop.f32.mrb[0].mxu1 }
 0x129   :  { %v210_v17 = vrot.slane %v136_v16, %v209_v15  ;;  %v551_v18 = vpop.f32.mrb[1].mxu0  ;;  %v559_v22 = vpop.f32.mrb[1].mxu1 }
 0x12a   :  { %v139_v21 = vpop.f32.mrb[2].mxu0  ;;  %v199_v26 = vpop.f32.mrb[2].mxu1 }
 0x12b   :  { %v211_v23 = vcombine.high %v210_v17, %v210_v17  ;;  %v218_v24 = vrot.slane %v210_v17, %v209_v15  ;;  %v552_v25 = vpop.f32.mrb[3].mxu0  ;;  %v560_v27 = vpop.f32.mrb[3].mxu1 }
 0x12d   :  { %v229_v28 = vrot.slane %v218_v24, %v848_v20  ;;  %v225_v29 = vrot.slane %v211_v23, %v209_v15 }
 0x12f   :  { %v236_v30 = vadd.f32 %v229_v28, %v196_v19  ;;  %v233_v31 = vrot.slane %v225_v29, %v848_v20 }
 0x131   :  { %591 = vtanh.f32 %v236_v30  ;;  %v237_v32 = vadd.f32 %v233_v31, %v199_v26 }
 0x133   :  { %593 = vtanh.f32 %v237_v32 }
 0x13b   :  { %v592_v34 = vpop.eup %591 }
 0x13c   :  { %v247_v35 = vmul.f32 %v592_v34, %v532_v33 }
 0x13d   :  { %v594_v36 = vpop.eup %593 }
 0x13e   :  { %249 = vadd.xlane.f32.xlu0 %v247_v35  ;;  %v248_v37 = vmul.f32 %v594_v36, %v532_v33 }
 0x142   :  { %251 = vadd.xlane.f32.xlu0 %v248_v37 }
 0x1cb   :  { %v250_v39 = vpop.xlane.xlu0 %249 }
 0x1cc   :  { %v260_v42 = vrot.slane %v250_v39, %v259_v40 }
 0x1cf   :  { %v252_v41 = vpop.xlane.xlu0 %251 }
 0x1d0   :  { %v264_v43 = vrot.slane %v252_v41, %v259_v40 }
 0x1d2   :  { %v266_v44 = vsel %vm265_vm2, %v264_v43, %v260_v42 }
 0x1d3   :  { %v269_v45 = vsel %vm268_vm3, %v266_v44, -inf }
 0x1d4   :  { %270 = vmax.xlane.f32.xlu1 %v269_v45 }
 0x261   :  { %v271_v48 = vpop.xlane.xlu1 %270 }
 0x262   :  { %v276_v49 = vrot.slane %v271_v48, %v848_v20  ;;  %v280_v50 = vrot.slane %v271_v48, %v279_v47 }
 0x264   :  { %v283_v51 = vsub.f32 %v250_v39, %v276_v49  ;;  %v284_v52 = vsub.f32 %v252_v41, %v280_v50 }
 0x266   :  { %v285_v53 = vmul.f32 1.442695, %v283_v51  ;;  %v287_v54 = vmul.f32 1.442695, %v284_v52 }
 0x268   :  { %595 = vpow2.f32 %v285_v53 }
 0x269   :  { %597 = vpow2.f32 %v287_v54 }
 0x272   :  { %v596_v55 = vpop.eup %595 }
 0x273   :  { %v598_v56 = vpop.eup %597  ;;  %292 = vperm.xlu1 %585, %v596_v55  }
 0x274   :  { %295 = vperm.xlu0 %586, %v598_v56  }
 0x2f2   :  { %v293_v57 = vpop.permute.xlu1 %292 }
 0x2f3   :  { %v296_v58 = vpop.permute.xlu0 %295  ;;  %v300_v59 = vrot.slane %v293_v57, %v259_v40 }
 0x2f4   :  { %v304_v60 = vrot.slane %v296_v58, %v259_v40 }
 0x2f6   :  { %v305_v61 = vsel %vm265_vm2, %v304_v60, %v300_v59 }
 0x2f7   :  { %v307_v62 = vsel %vm268_vm3, %v305_v61, 0.0 }
 0x2f8   :  { %308 = vadd.xlane.f32.xlu1 %v307_v62 }
 0x385   :  { %v309_v63 = vpop.xlane.xlu1 %308 }
 0x386   :  { %599 = vrcp.f32 %v309_v63 }
 0x390   :  { %v600_v0 = vpop.eup %599 }
 0x391   :  { %v319_v1 = vrot.slane %v600_v0, %v279_v47  ;;  %v315_v3 = vrot.slane %v600_v0, %v848_v20 }
 0x393   :  { %v323_v2 = vmul.f32 %v598_v56, %v319_v1  ;;  %v322_v4 = vmul.f32 %v596_v55, %v315_v3 }
 0x395   :  { %407 = vperm.xlu0 %586, %v323_v2  }
 0x399   :  { %326 = vperm.xlu0 %586, %v322_v4  }
 0x414   :  { %v408_v5 = vpop.permute.xlu0 %407 }
 0x415   :  { %v412_v6 = vrot.slane %v408_v5, %v259_v40 }
 0x417   :  { %569 = vmatmul.mubr.msk.f32.vlgmr.msra.gmra.mrb[4].mxu1 %vm332_vm4, %v412_v6 }
 0x418   :  { %v327_v7 = vpop.permute.xlu0 %326 }
 0x419   :  { %v331_v8 = vrot.slane %v327_v7, %v259_v40 }
 0x41b   :  { %564 = vmatmul.mubr.msk.f32.vlgmr.msra.gmra.mrb[4].mxu0 %vm332_vm4, %v331_v8  ;;  %v492_v9 = vsel %vm265_vm2, %v412_v6, %v331_v8 }
 0x41c   :  { %494 = vst.msk [vmem:[#allocation11] sm:$0x3] %vm268_vm3, %v492_v9 }
 0x41d   :  { %700 = shalt.err (!%p697_p8)
}
 0x41e   :  { %s701_s26 = scalar_lea.hbm %s896_s6, 32 }
 0x41f   :  { %p702_p9 = scmp.ne.s32.totalorder %s896_s6, %s701_s26  ;;  %p705_p10 = scmp.lt.u32.totalorder %s701_s26, %s896_s6 }
 0x421   :  { %p707_p11 = pnand %p705_p10, %p702_p9 }
 0x423   :  { %710 = shalt.err (!%p707_p11)
}
 0x424   :  { %514 = dma.vmem_to_hbm [thread:$0]  %s512_s22, 32, %s896_s6, [#allocation12]   ;;  %vm490_vm5 = vcmask 254976  }
 0x425   :  { %s756_s8 = smov [#allocation10]  }
 0x426   :  { %s501_s9 = sshll.u32 %s756_s8, 4  ;;  %s502_s9 = int_to_ptr.vmem [resolvable:$true] %s501_s9 }
 0x427   :  { %s711_s10 = scalar_lea.vmem %s502_s9, 32  ;;  %p716_p13 = scmp.lt.s32.totalorder %s502_s9, %s502_s9 }
 0x428   :  { %p712_p12 = scmp.ne.s32.totalorder %s502_s9, %s711_s10  ;;  %p717_p0 = scmp.lt.s32.totalorder %s711_s10, %s711_s10 }
 0x42a   :  { %p718_p1 = por %p717_p0, %p716_p13 }
 0x42c   :  { %p719_p2 = pnand %p718_p1, %p712_p12 }
 0x4ea   :  { %v481_v10 = vpop.f32.mrb[4].mxu1 }
 0x4eb   :  { %v570_v11 = vpop.f32.mrb[5].mxu1  ;;  %v487_v12 = vrot.slane %v481_v10, 7 }
 0x4ee   :  { %v401_v13 = vpop.f32.mrb[4].mxu0 }
 0x4ef   :  { %v488_v14 = vsel %vm265_vm2, %v487_v12, %v401_v13  ;;  %v565_v15 = vpop.f32.mrb[5].mxu0 }
 0x4f0   :  { %491 = vst.msk [vmem:[#allocation10] sm:$0x3] %vm490_vm5, %v488_v14 }
 0x4f1   :  { %722 = shalt.err (!%p719_p2)
}
 0x4f2   :  { %s723_s12 = scalar_lea.hbm %s895_s5, 32 }
 0x4f3   :  { %p724_p3 = scmp.ne.s32.totalorder %s895_s5, %s723_s12  ;;  %p727_p4 = scmp.lt.u32.totalorder %s723_s12, %s895_s5 }
 0x4f5   :  { %p729_p5 = pnand %p727_p4, %p724_p3 }
 0x4f7   :  { %732 = shalt.err (!%p729_p5)
}
 0x4f8   :  { %504 = dma.vmem_to_hbm [thread:$0]  %s502_s9, 32, %s895_s5, [#allocation4]  }
 0x4f9   :  { %739 = dma.done.wait [#allocation4], 32  }
 0x4fa   :  { %740 = vsyncadd [#allocation4], 4294967264 }
 0x4fb   :  { %741 = dma.done.wait [#allocation12], 32  }
 0x4fc   :  { %742 = vsyncadd [#allocation12], 4294967264 }
 0x4fd   :  { %521 = vsyncpa [#allocation3], 1 }
 0x4fe   :  { %522 = vsyncpa [#allocation6], 1 }
 0x4ff   :  { %523 = vsyncpa [#allocation9], 1 }
 0x500   :  { %524 = vsyncpa [#allocation4], 1 }
 0x501   :  { %525 = vsyncpa [#allocation12], 1 }

</bundles_post_ra>
